<compile_context>
chip_gen: v7x
topology: tpu7x:2x2x1
jax: 0.10.0
libtpu: 0.0.40
codegen_flags: <defaults>
</compile_context>

<pallas_src>
import math

import jax
import jax.numpy as jnp
from jax.experimental import pallas as pl
from jax.experimental.pallas import tpu as pltpu


def _cdiv(a, b):
    return -(-a // b)


def _round_up(v, m):
    return _cdiv(v, m) * m


def _vmem_capacity_bytes():
    """Physical VMEM per TensorCore; conservative 64 MiB (v7x) fallback."""
    try:
        info = pltpu.get_tpu_info()
        cap = getattr(info, "vmem_capacity_bytes", None)
        if cap:
            return int(cap)
    except Exception:
        pass
    return 64 << 20


def _choose_tile_m(n, tile_m, gran=8):
    """Row tile: multiple of `gran`, balanced, and an even number of grid
    steps when possible so both v7x TensorCores receive equal work."""
    tile_m = max(gran, (int(tile_m) // gran) * gran)
    n_al = _round_up(max(int(n), 1), gran)
    tile_m = min(tile_m, n_al)
    steps = _cdiv(n_al, tile_m)
    if n_al >= 2 * gran:
        if steps < 2:
            steps = 2
        if steps % 2:
            steps += 1
        tile_m = min(tile_m, max(gran, _round_up(_cdiv(n_al, steps), gran)))
    return tile_m


def _hybonet_kernel(scalars_ref, x_ref, w_ref, b_ref, o_ref):
    """One (row-tile, K-tile) step of the HyboNet linear forward.

    scalars_ref : (3,)            SMEM  [exp(log_scale), sqrt(c)+0.5, c]
    x_ref       : (TM, TK)        VMEM  (f32 or bf16)
    w_ref       : (TK, Dout)      VMEM  (W^T tile, same dtype as x)
    b_ref       : (1, Dout)       VMEM  f32
    o_ref       : (TM, Dout)      VMEM  f32 (accumulator; resident across K)
    """
    k = pl.program_id(1)

    @pl.when(k == 0)
    def _init():
        o_ref[...] = jnp.zeros_like(o_ref)

    # Linear layer on the MXU, f32 accumulation into the resident output tile.
    o_ref[...] += jnp.dot(x_ref[...], w_ref[...],
                          preferred_element_type=jnp.float32)

    @pl.when(k == pl.num_programs(1) - 1)
    def _epilogue():
        y = o_ref[...] + b_ref[...]

        scale_exp = scalars_ref[0]    # exp(log_scale), hoisted to the wrapper
        time_offset = scalars_ref[1]  # sqrt(c) + 0.5,  hoisted to the wrapper
        c = scalars_ref[2]

        # Column index over the feature (lane) axis; column 0 = "time" coord.
        col = jax.lax.broadcasted_iota(jnp.int32, y.shape, dimension=1)
        is_time = col == 0

        # y0 = y[:, 0:1] via masked lane reduction (avoids narrow slices).
        y0 = jnp.sum(jnp.where(is_time, y, 0.0), axis=-1, keepdims=True)
        time = jax.nn.sigmoid(y0) * scale_exp + time_offset           # (TM, 1)

        # Masked sum over the narrow coordinates (no sum(y^2)-y0^2
        # cancellation); the extra select is VALU filler in a mem-bound kernel.
        y_narrow = jnp.where(is_time, 0.0, y)
        denom = jnp.maximum(
            jnp.sum(y_narrow * y_narrow, axis=-1, keepdims=True), 1e-6)

        s = (time * time - c) / denom
        factor = jnp.sqrt(jnp.maximum(s, 1e-6))                       # (TM, 1)

        o_ref[...] = jnp.where(is_time, time,
                               y_narrow * factor).astype(o_ref.dtype)


def hybonet_linear(x, weight, bias, log_scale, c, *, tile_m=512,
                   compute_dtype=jnp.float32, transposed_weight=False,
                   k_tile=None):
    """HyboNetLinear forward (eval mode).

    x                 : (..., in_features)
    weight            : (out_features, in_features) torch convention, or
                        (in_features, out_features) if transposed_weight=True
                        (pre-transpose once outside the hot path to avoid a
                        per-call W^T materialization).
    bias              : (out_features,)
    log_scale         : scalar (log of the time-coordinate scale)
    c                 : scalar curvature of the Lorentz manifold
    compute_dtype     : dtype fed to the MXU for x / W^T (f32 default;
                        bf16 halves HBM traffic but loosens accuracy).
    k_tile            : force a K-split with this tile (testing / huge W).
    returns           : (..., out_features) float32
    """
    in_features = x.shape[-1]
    w_t = weight if transposed_weight else weight.T        # (Din, Dout)
    assert w_t.shape[0] == in_features
    out_features = w_t.shape[1]

    lead_shape = x.shape[:-1]
    n = int(math.prod(lead_shape)) if lead_shape else 1

    in_bytes = jnp.dtype(compute_dtype).itemsize
    gran = 8 if in_bytes == 4 else 16                      # bf16 packs (16,128)
    tile_m = _choose_tile_m(n, tile_m, gran)
    grid_m = _cdiv(n, tile_m)

    vmem_cap = max(16 << 20, _vmem_capacity_bytes() - (8 << 20))
    budget = (3 * vmem_cap) // 4                           # leave pipeline headroom

    def _need(kk):
        # Double-buffered x / out tiles + (conservatively double-buffered)
        # W tile + bias.
        return (2 * tile_m * kk * in_bytes
                + 2 * tile_m * out_features * 4
                + 2 * kk * out_features * in_bytes
                + 2 * out_features * 4)

    use_k_split = (k_tile is not None) or (_need(in_features) > budget)

    x_flat = x.reshape(n, in_features).astype(compute_dtype)   # free view if f32
    w_t = w_t.astype(compute_dtype)

    if use_k_split:
        # Large-W path: tile the contraction axis (last grid axis, "arbitrary")
        # and accumulate into the resident f32 output block.
        if k_tile is not None:
            tile_k = _round_up(int(k_tile), 128)
        else:
            tile_k = 128
            for cand in (2048, 1024, 512, 256):
                if _need(cand) <= budget:
                    tile_k = cand
                    break
        tile_k = min(tile_k, _round_up(in_features, 128))
        din_p = _round_up(in_features, tile_k)
        if din_p != in_features:
            pad_k = din_p - in_features
            x_flat = jnp.pad(x_flat, ((0, 0), (0, pad_k)))
            w_t = jnp.pad(w_t, ((0, pad_k), (0, 0)))
        num_k = din_p // tile_k
    else:
        # Fast path: full-extent K block -> no padding, no extra HBM copies,
        # resident W^T in VMEM.
        tile_k = in_features
        num_k = 1

    b2d = bias.astype(jnp.float32).reshape(1, out_features)

    c_f = jnp.asarray(c, jnp.float32)
    scalars = jnp.stack([
        jnp.exp(jnp.asarray(log_scale, jnp.float32)),  # exp(log_scale)
        jnp.sqrt(c_f) + 0.5,                           # time offset
        c_f,                                           # curvature
    ])

    vmem_limit = int(min(max(2 * _need(tile_k), 32 << 20), vmem_cap))

    out_flat = pl.pallas_call(
        _hybonet_kernel,
        out_shape=jax.ShapeDtypeStruct((n, out_features), jnp.float32),
        grid=(grid_m, num_k),
        in_specs=[
            pl.BlockSpec(memory_space=pltpu.SMEM),                     # scalars
            pl.BlockSpec((tile_m, tile_k), lambda i, k: (i, k)),       # x tile
            pl.BlockSpec((tile_k, out_features), lambda i, k: (k, 0)), # W^T tile
            pl.BlockSpec((1, out_features), lambda i, k: (0, 0)),      # bias
        ],
        out_specs=pl.BlockSpec((tile_m, out_features), lambda i, k: (i, 0)),
        compiler_params=pltpu.CompilerParams(
            dimension_semantics=("parallel", "arbitrary"),
            vmem_limit_bytes=vmem_limit),
    )(scalars, x_flat, w_t, b2d)

    return out_flat.reshape(*lead_shape, out_features)


def hybonet_linear_reference(x, weight, bias, log_scale, c):
    """Pure-JAX reference matching the PyTorch forward (eval mode)."""
    y = x @ weight.T + bias
    x_narrow = y[..., 1:]
    time = jax.nn.sigmoid(y[..., 0:1]) * jnp.exp(log_scale) + (jnp.sqrt(c) + 0.5)
    denom = jnp.maximum(jnp.sum(x_narrow * x_narrow, axis=-1, keepdims=True), 1e-6)
    s = (time * time - c) / denom
    return jnp.concatenate([time, x_narrow * jnp.sqrt(jnp.maximum(s, 1e-6))],
                           axis=-1)


def init_params(key, in_features, out_features, scale=10.0, c=1.0):
    """Deterministic parameter init mirroring HyboNetLinear.reset_parameters."""
    stdv = 1.0 / math.sqrt(out_features)
    w_key, = jax.random.split(key, 1)
    weight = jax.random.uniform(
        w_key, (out_features, in_features), jnp.float32, minval=-stdv, maxval=stdv)
    # reset_parameters zeroes column 0 (step == in_features -> only idx 0).
    weight = weight.at[:, 0].set(0.0)
    bias = jnp.zeros((out_features,), jnp.float32)
    log_scale = jnp.asarray(math.log(scale), jnp.float32)
    curvature = jnp.asarray(c, jnp.float32)
    return weight, bias, log_scale, curvature


if __name__ == "__main__":
    key = jax.random.PRNGKey(0)
    k1, k2, k3, k4, k5, k6 = jax.random.split(key, 6)

    # Case 1: module-sized shapes (batch=2, seq=8, hidden=32).
    x = jax.random.normal(k1, (2, 8, 32), jnp.float32)
    w, b, ls, c = init_params(k2, 32, 32, scale=10.0, c=1.0)
    out = jax.block_until_ready(hybonet_linear(x, w, b, ls, c))
    ref = hybonet_linear_reference(x, w, b, ls, c)
    assert out.shape == ref.shape, (out.shape, ref.shape)
    assert jnp.allclose(out, ref, atol=1e-4, rtol=1e-4), (
        float(jnp.max(jnp.abs(out - ref))))

    # Case 2: non-128-multiple features (96 -> 80), multi-row-tile grid,
    # zero-copy path (no padding of x / W / output).
    x2 = jax.random.normal(k3, (4, 160, 96), jnp.float32)
    w2, b2, ls2, c2 = init_params(k4, 96, 80, scale=10.0, c=1.0)
    out2 = jax.block_until_ready(hybonet_linear(x2, w2, b2, ls2, c2))
    ref2 = hybonet_linear_reference(x2, w2, b2, ls2, c2)
    assert out2.shape == ref2.shape, (out2.shape, ref2.shape)
    assert jnp.allclose(out2, ref2, atol=1e-4, rtol=1e-4), (
        float(jnp.max(jnp.abs(out2 - ref2))))

    # Case 3: forced K-split (exercises the accumulator / pl.when(k==last)
    # epilogue path used automatically for large weights on v7x's 64 MiB VMEM).
    x3 = jax.random.normal(k5, (2, 40, 200), jnp.float32)
    w3, b3, ls3, c3 = init_params(k6, 200, 96, scale=10.0, c=1.0)
    out3 = jax.block_until_ready(hybonet_linear(x3, w3, b3, ls3, c3, k_tile=128))
    ref3 = hybonet_linear_reference(x3, w3, b3, ls3, c3)
    assert out3.shape == ref3.shape, (out3.shape, ref3.shape)
    assert jnp.allclose(out3, ref3, atol=2e-4, rtol=2e-4), (
        float(jnp.max(jnp.abs(out3 - ref3))))

    print("KERNEL_OK")
</pallas_src>

<mosaic_0001>
module attributes {stable_mosaic.version = 11 : i64} {
  func.func @_hybonet_kernel(%arg0: i32, %arg1: i32, %arg2: memref<3xf32, #tpu.memory_space<smem>>, %arg3: memref<8x32xf32, #tpu.memory_space<vmem>>, %arg4: memref<32x32xf32, #tpu.memory_space<vmem>>, %arg5: memref<1x32xf32, #tpu.memory_space<vmem>>, %arg6: memref<8x32xf32, #tpu.memory_space<vmem>>) attributes {dimension_semantics = [#tpu.dimension_semantics<parallel>, #tpu.dimension_semantics<arbitrary>], iteration_bounds = array<i64: 2, 1>, scalar_prefetch = 0 : i64, scratch_operands = 0 : i64, tpu.core_type = #tpu.core_type<tc>, window_params = [{transform_indices = @transform_0, window_bounds = array<i64: 3>}, {transform_indices = @transform_1, window_bounds = array<i64: 8, 32>}, {transform_indices = @transform_2, window_bounds = array<i64: 32, 32>}, {pipeline_mode = #tpu.pipeline_mode<synchronous>, transform_indices = @transform_3, window_bounds = array<i64: 1, 32>}, {transform_indices = @transform_4, window_bounds = array<i64: 8, 32>}]} {
    %c0_i32 = arith.constant 0 : i32
    %0 = arith.cmpi eq, %arg1, %c0_i32 : i32
    %1 = arith.extui %0 : i1 to i32
    %c0_i32_0 = arith.constant 0 : i32
    %2 = arith.cmpi ne, %1, %c0_i32_0 : i32
    scf.if %2 {
      %cst_10 = arith.constant 0.000000e+00 : f32
      %12 = vector.broadcast %cst_10 : f32 to vector<8x32xf32>
      %c0_11 = arith.constant 0 : index
      %c0_12 = arith.constant 0 : index
      %13 = vector.load %arg6[%c0_11, %c0_12] : memref<8x32xf32, #tpu.memory_space<vmem>>, vector<8x32xf32>
      tpu.vector_store %arg6[%c0_11, %c0_12], %12 {strides = array<i32>} : memref<8x32xf32, #tpu.memory_space<vmem>>, vector<8x32xf32>,
    } else {
    }
    %c0 = arith.constant 0 : index
    %c0_1 = arith.constant 0 : index
    %3 = vector.load %arg6[%c0, %c0_1] : memref<8x32xf32, #tpu.memory_space<vmem>>, vector<8x32xf32>
    %c0_2 = arith.constant 0 : index
    %c0_3 = arith.constant 0 : index
    %4 = vector.load %arg3[%c0_2, %c0_3] : memref<8x32xf32, #tpu.memory_space<vmem>>, vector<8x32xf32>
    %c0_4 = arith.constant 0 : index
    %c0_5 = arith.constant 0 : index
    %5 = vector.load %arg4[%c0_4, %c0_5] : memref<32x32xf32, #tpu.memory_space<vmem>>, vector<32x32xf32>
    %cst = arith.constant dense<0.000000e+00> : vector<8x32xf32>
    %6 = tpu.matmul %4, %5, %cst {dimension_numbers = #tpu.dot_dimension_numbers<[1], [0], [0], [1], [0, 0, 1, 1], [], []>} : vector<8x32xf32>, vector<32x32xf32>, vector<8x32xf32> -> vector<8x32xf32>
    %7 = arith.addf %3, %6 : vector<8x32xf32>
    %c0_6 = arith.constant 0 : index
    %c0_7 = arith.constant 0 : index
    %8 = vector.load %arg6[%c0_6, %c0_7] : memref<8x32xf32, #tpu.memory_space<vmem>>, vector<8x32xf32>
    tpu.vector_store %arg6[%c0_6, %c0_7], %7 {strides = array<i32>} : memref<8x32xf32, #tpu.memory_space<vmem>>, vector<8x32xf32>,
    %c0_i32_8 = arith.constant 0 : i32
    %9 = arith.cmpi eq, %arg1, %c0_i32_8 : i32
    %10 = arith.extui %9 : i1 to i32
    %c0_i32_9 = arith.constant 0 : i32
    %11 = arith.cmpi ne, %10, %c0_i32_9 : i32
    scf.if %11 {
      %c0_10 = arith.constant 0 : index
      %c0_11 = arith.constant 0 : index
      %12 = vector.load %arg6[%c0_10, %c0_11] : memref<8x32xf32, #tpu.memory_space<vmem>>, vector<8x32xf32>
      %c0_12 = arith.constant 0 : index
      %c0_13 = arith.constant 0 : index
      %13 = vector.load %arg5[%c0_12, %c0_13] : memref<1x32xf32, #tpu.memory_space<vmem>>, vector<1x32xf32>
      %14 = vector.broadcast %13 : vector<1x32xf32> to vector<8x32xf32>
      %15 = arith.addf %12, %14 : vector<8x32xf32>
      %c0_14 = arith.constant 0 : index
      %16 = memref.load %arg2[%c0_14] : memref<3xf32, #tpu.memory_space<smem>>
      %c1 = arith.constant 1 : index
      %17 = memref.load %arg2[%c1] : memref<3xf32, #tpu.memory_space<smem>>
      %c2 = arith.constant 2 : index
      %18 = memref.load %arg2[%c2] : memref<3xf32, #tpu.memory_space<smem>>
      %19 = tpu.iota {dimensions = array<i32: 1>} : vector<8x32xi32>
      %c0_i32_15 = arith.constant 0 : i32
      %20 = vector.broadcast %c0_i32_15 : i32 to vector<8x32xi32>
      %21 = arith.cmpi eq, %19, %20 : vector<8x32xi32>
      %cst_16 = arith.constant 0.000000e+00 : f32
      %22 = vector.broadcast %cst_16 : f32 to vector<8x32xf32>
      %23 = arith.select %21, %15, %22 : vector<8x32xi1>, vector<8x32xf32>
      %cst_17 = arith.constant dense<0.000000e+00> : vector<8xf32>
      %24 = vector.multi_reduction <add>, %23, %cst_17 [1] : vector<8x32xf32> to vector<8xf32>
      %25 = vector.shape_cast %24 : vector<8xf32> to vector<8x1xf32>
      %26 = arith.negf %25 : vector<8x1xf32>
      %27 = math.exp %26 : vector<8x1xf32>
      %cst_18 = arith.constant 1.000000e+00 : f32
      %28 = vector.broadcast %cst_18 : f32 to vector<8x1xf32>
      %29 = arith.addf %28, %27 : vector<8x1xf32>
      %30 = arith.divf %28, %29 : vector<8x1xf32>
      %31 = vector.broadcast %16 : f32 to vector<8x1xf32>
      %32 = arith.mulf %30, %31 : vector<8x1xf32>
      %33 = vector.broadcast %17 : f32 to vector<8x1xf32>
      %34 = arith.addf %32, %33 : vector<8x1xf32>
      %cst_19 = arith.constant 0.000000e+00 : f32
      %35 = vector.broadcast %cst_19 : f32 to vector<8x32xf32>
      %36 = arith.select %21, %35, %15 : vector<8x32xi1>, vector<8x32xf32>
      %37 = arith.mulf %36, %36 : vector<8x32xf32>
      %cst_20 = arith.constant dense<0.000000e+00> : vector<8xf32>
      %38 = vector.multi_reduction <add>, %37, %cst_20 [1] : vector<8x32xf32> to vector<8xf32>
      %39 = vector.shape_cast %38 : vector<8xf32> to vector<8x1xf32>
      %cst_21 = arith.constant 9.99999997E-7 : f32
      %40 = vector.broadcast %cst_21 : f32 to vector<8x1xf32>
      %41 = arith.maximumf %39, %40 : vector<8x1xf32>
      %42 = arith.mulf %34, %34 : vector<8x1xf32>
      %43 = vector.broadcast %18 : f32 to vector<8x1xf32>
      %44 = arith.subf %42, %43 : vector<8x1xf32>
      %45 = arith.divf %44, %41 : vector<8x1xf32>
      %cst_22 = arith.constant 9.99999997E-7 : f32
      %46 = vector.broadcast %cst_22 : f32 to vector<8x1xf32>
      %47 = arith.maximumf %45, %46 : vector<8x1xf32>
      %48 = math.sqrt %47 : vector<8x1xf32>
      %49 = vector.broadcast %48 : vector<8x1xf32> to vector<8x32xf32>
      %50 = arith.mulf %36, %49 : vector<8x32xf32>
      %51 = vector.shape_cast %34 : vector<8x1xf32> to vector<8x1xf32>
      %52 = vector.broadcast %51 : vector<8x1xf32> to vector<8x32xf32>
      %53 = arith.select %21, %52, %50 : vector<8x32xi1>, vector<8x32xf32>
      %c0_23 = arith.constant 0 : index
      %c0_24 = arith.constant 0 : index
      %54 = vector.load %arg6[%c0_23, %c0_24] : memref<8x32xf32, #tpu.memory_space<vmem>>, vector<8x32xf32>
      tpu.vector_store %arg6[%c0_23, %c0_24], %53 {strides = array<i32>} : memref<8x32xf32, #tpu.memory_space<vmem>>, vector<8x32xf32>,
    } else {
    }
    return
  }
  func.func @transform_0(%arg0: i32, %arg1: i32) -> i32 {
    %c0_i32 = arith.constant 0 : i32
    %c0_i32_0 = arith.constant 0 : i32
    return %c0_i32 : i32
  }
  func.func @transform_1(%arg0: i32, %arg1: i32) -> (i32, i32) {
    %c0_i32 = arith.constant 0 : i32
    return %arg0, %arg1 : i32, i32
  }
  func.func @transform_2(%arg0: i32, %arg1: i32) -> (i32, i32) {
    %c0_i32 = arith.constant 0 : i32
    %c0_i32_0 = arith.constant 0 : i32
    return %arg1, %c0_i32 : i32, i32
  }
  func.func @transform_3(%arg0: i32, %arg1: i32) -> (i32, i32) {
    %c0_i32 = arith.constant 0 : i32
    %c0_i32_0 = arith.constant 0 : i32
    %c0_i32_1 = arith.constant 0 : i32
    return %c0_i32, %c0_i32_0 : i32, i32
  }
  func.func @transform_4(%arg0: i32, %arg1: i32) -> (i32, i32) {
    %c0_i32 = arith.constant 0 : i32
    %c0_i32_0 = arith.constant 0 : i32
    return %arg0, %c0_i32 : i32, i32
  }
}

</mosaic_0001>

<bundles_post_ra>
// kernel: tpu_custom_call.1
= control target key start
LH: loop header
LB: loop body
LE: loop exit
PB: predicated region body
PF: predicated region fallthrough
CT: control target
= control target key end

     0   :  { %9 = vsyncpa [#allocation5], 0  ;;  %s1124_s0 = inlined_call_operand.hbm [shape: f32[3], index: 0, kind: input, shape index: {}]   ;;  %s1125_s1 = inlined_call_operand.hbm [shape: f32[16,32], index: 1, kind: input, shape index: {}]   ;;  %s1126_s2 = inlined_call_operand.hbm [shape: f32[32,32], index: 2, kind: input, shape index: {}]   ;;  %s1127_s3 = inlined_call_operand.vmem [shape: f32[1,32], index: 3, kind: input, shape index: {}]   ;;  %s1128_s4 = inlined_call_operand.hbm [shape: f32[16,32], index: 4, kind: output, shape index: {}]  }
   0x1   :  { %10 = vsyncpa [#allocation3], 0 }
   0x2   :  { %12 = vsyncpa [#allocation3 + $0x1], 0 }
   0x3   :  { %13 = vsyncpa [#allocation8], 0 }
   0x4   :  { %14 = vsyncpa [#allocation4], 0 }
   0x5   :  { %16 = vsyncpa [#allocation4 + $0x1], 0  ;;  %s860_s15 = smov 0   ;;  %s862_s16 = smov 0  }
   0x6   :  { %s864_s17 = smov 0   ;;  %s866_s18 = smov 0  }
   0x7   :  { %s868_s19 = smov 0   ;;  %s870_s20 = smov 0  }
   0x8 LB: > { %s523_s21 = sadd.s32 4294967295, %s824_s20   ;;  %s524_s22 = sadd.s32 4294967294, %s824_s20   ;;  %s824_s20 = sphi %s870_s20, %s22_s20   ;;  %s820_s19 = sphi %s868_s19, %s1150_s19   ;;  %s816_s18 = sphi %s866_s18, %s1149_s18   ;;  %s812_s17 = sphi %s864_s17, %s1148_s17   ;;  %s808_s16 = sphi %s862_s16, %s1147_s16   ;;  %s804_s15 = sphi %s860_s15, %s1146_s15  }
   0x9   : > { %p77_p0 = scmp.ne.s32.totalorder %s808_s16, %s804_s15  ;;  %p894_p1 = scmp.eq.s32.totalorder %s523_s21, 0 }
   0xa   : > { %p898_p2 = scmp.eq.s32.totalorder %s523_s21, 1  ;;  %p154_p3 = scmp.eq.s32.totalorder %s524_s22, 1 }
   0xb   : > { %s1133_s23 = scalar_select %p894_p1, 1, 0 }
   0xc   : > { %p904_p4 = por %p894_p1, %p77_p0  ;;  %p525_p5 = scmp.ge.s32.totalorder %s824_s20, 1 }
   0xd   : > { %p909_p6 = por %p154_p3, %p77_p0  ;;  %p161_p7 = scmp.lt.s32.totalorder %s824_s20, 3 }
   0xe   : > { %s1135_s25 = scalar_select %p904_p4, 1, 0 }
   0xf   : > { %s1136_s26 = scalar_select %p909_p6, 1, 0 }
  0x10   : > { %p914_p8 = pnand %p525_p5, %p161_p7  ;;  %s826_s28 = smov [#allocation7]  }
  0x11   : > { %s185_s29 = sshll.u32 %s826_s28, 4  ;;  %s663_s7 = scalar_lea.hbm %s1124_s0, 16  ;;  %s921_s29 = int_to_ptr.vmem [resolvable:$true] %s185_s29 }
  0x12   : > { %p579_p10 = pneg %p914_p8  ;;  %p664_p12 = scmp.ne.s32.totalorder %s1124_s0, %s663_s7 }
  0x13   : > { %p670_p5 = scmp.lt.u32.totalorder %s663_s7, %s1124_s0 }
  0x14   : > { %p925_p11 = pnand %p579_p10, %p894_p1 }
  0x16   : > { %p665_p13 = pneg %p925_p11 }
  0x18   : > { %p666_p0 = pnand %p665_p13, %p664_p12 }
  0x1a   : > { %p667_p3 = pneg %p666_p0 }
  0x1c   : > { %p672_p7 = pnand %p670_p5, %p667_p3 }
  0x1e   : > { %675 = shalt.err (!%p672_p7)
}
  0x1f   : > { %s827_s12 = smov [#allocation2]   ;;  %s676_s28 = scalar_lea.hbm %s1126_s2, 512 }
  0x20   : > { %582 = dma.hbm_to_smem (!%p925_p11), %s1124_s0, 16, %s827_s12, [#allocation5]  }
  0x21   : > { %p677_p10 = scmp.ne.s32.totalorder %s1126_s2, %s676_s28  ;;  %p683_p3 = scmp.lt.u32.totalorder %s676_s28, %s1126_s2 }
  0x23   : > { %p679_p12 = pnand %p677_p10, %p665_p13 }
  0x25   : > { %p680_p0 = pneg %p679_p12 }
  0x27   : > { %p685_p5 = pnand %p683_p3, %p680_p0 }
  0x29   : > { %688 = shalt.err (!%p685_p5)
}
  0x2a   : > { %s689_s9 = scalar_lea.vmem %s921_s29, 512  ;;  %p697_p4 = scmp.lt.s32.totalorder %s921_s29, %s921_s29 }
  0x2b   : > { %p690_p7 = scmp.ne.s32.totalorder %s921_s29, %s689_s9  ;;  %p698_p10 = scmp.lt.s32.totalorder %s689_s9, %s689_s9 }
  0x2d   : > { %p692_p9 = pnand %p690_p7, %p665_p13  ;;  %p699_p12 = por %p698_p10, %p697_p4 }
  0x2f   : > { %p693_p6 = pneg %p692_p9 }
  0x31   : > { %p700_p1 = pnand %p699_p12, %p693_p6 }
  0x33   : > { %703 = shalt.err (!%p700_p1)
}
  0x34   : > { %s828_s10 = smov 128   ;;  %s829_s11 = smov 8  }
  0x35   : > { %585 = dma.hbm_to_vmem [thread:$0]  (!%p925_p11), %s1126_s2, 512, %s921_s29, [#allocation8], %s828_s10, %s828_s10, %s829_s11  }
  0x36   : > { %s34_s14 = sadd.s32 1, %s820_s19  ;;  %s64_s21 = sadd.s32 1, %s812_s17 }
  0x37   : > { %p36_p1 = scmp.ge.s32.totalorder %s34_s14, 2  ;;  %p71_p4 = scmp.ne.s32.totalorder %s812_s17, %s808_s16 }
  0x38   : > { %p72_p6 = scmp.eq.s32.totalorder %s824_s20, 0  ;;  %p596_p9 = scmp.lt.s32.totalorder %s824_s20, 2 }
  0x39   : > { %s1152_s14 = smov (%p36_p1, %s34_s14), 0  ;;  %p983_p0 = por %p898_p2, %p71_p4 }
  0x3a   : > { %p73_p13 = por %p72_p6, %p71_p4  ;;  %s59_s30 = ssub.s32 %s820_s19, %s1152_s14 }
  0x3b   : > { %s1139_s22 = scalar_select %p983_p0, 1, 0 }
  0x3c   : > { %s202_s28 = sand.u32 1, %s812_s17   ;;  %p62_p3 = scmp.eq.s32.totalorder %s59_s30, 0 }
  0x3d   : > { %s529_s29 = sshll.u32 %s202_s28, 3  ;;  %s530_s5 = sshll.u32 %s820_s19, 7 }
  0x3e   : > { %s992_s6 = scalar_select %p62_p3, %s812_s17, %s64_s21  }
  0x3f   : > { %s997_s9 = scalar_lea.hbm %s1125_s1, %s530_s5  ;;  %s206_s24 = scalar_lea.vmem [#allocation6], %s529_s29 }
  0x40   : > { %s214_s10 = sshll.u32 %s206_s24, 4  ;;  %p1001_p2 = pnand %p596_p9, %p73_p13  ;;  %s1005_s10 = int_to_ptr.vmem [resolvable:$true] %s214_s10 }
  0x41   : > { %s203_s12 = scalar_lea.sflag [#allocation3], %s202_s28  ;;  %s704_s13 = scalar_lea.hbm %s997_s9, 128 }
  0x42   : > { %p705_p11 = scmp.ne.s32.totalorder %s997_s9, %s704_s13  ;;  %p706_p5 = pneg %p1001_p2 }
  0x43   : > { %s709_s29 = scalar_lea.hbm %s1125_s1, 256  ;;  %p710_p12 = scmp.lt.u32.totalorder %s997_s9, %s1125_s1 }
  0x44   : > { %p707_p7 = pnand %p706_p5, %p705_p11  ;;  %p711_p1 = scmp.lt.u32.totalorder %s709_s29, %s704_s13 }
  0x45   : > { %p713_p6 = scmp.lt.u32.totalorder %s704_s13, %s997_s9 }
  0x46   : > { %p708_p10 = pneg %p707_p7  ;;  %p712_p4 = por %p711_p1, %p710_p12 }
  0x48   : > { %p714_p9 = por %p713_p6, %p712_p4 }
  0x4a   : > { %p715_p13 = pnand %p714_p9, %p708_p10 }
  0x4c   : > { %718 = shalt.err (!%p715_p13)
}
  0x4d   : > { %s719_s28 = scalar_lea.vmem %s1005_s10, 128  ;;  %s830_s8 = smov [#allocation6]  }
  0x4e   : > { %p720_p3 = scmp.ne.s32.totalorder %s1005_s10, %s719_s28  ;;  %s724_s24 = sshll.u32 %s830_s8, 4  ;;  %s725_s24 = int_to_ptr.vmem [resolvable:$false] %s724_s24 }
  0x4f   : > { %s726_s21 = scalar_lea.vmem %s725_s24, 256  ;;  %p727_p0 = scmp.lt.s32.totalorder %s1005_s10, %s725_s24 }
  0x50   : > { %p722_p11 = pnand %p720_p3, %p706_p5  ;;  %p728_p12 = scmp.lt.s32.totalorder %s726_s21, %s719_s28 }
  0x52   : > { %p723_p7 = pneg %p722_p11  ;;  %p729_p1 = por %p728_p12, %p727_p0 }
  0x54   : > { %p730_p4 = pnand %p729_p1, %p723_p7 }
  0x56   : > { %733 = shalt.err (!%p730_p4)
}
  0x57   : > { %589 = dma.hbm_to_vmem [thread:$0]  (!%p1001_p2), %s997_s9, 128, %s1005_s10, %s203_s12  }
  0x58   : > { %223 = sbr.rel (%p914_p8) target bundleno = 552 (0x228), region = 36  ;;  %p1141_p5 = scmp.ne.s32.totalorder (!%p914_p8), %s1133_s23, 0 }
  0x5f   : > { %787 = dma.done.wait (%p1141_p5), [#allocation5], 16  }
  0x60   : > { %789 = vsyncadd (%p1141_p5), [#allocation5], 4294967280  ;;  %s1039_s13 = sand.u32 1, %s808_s16   ;;  %p1142_p0 = scmp.ne.s32.totalorder %s1135_s25, 0 }
  0x61   : > { %s533_s30 = sshll.u32 %s1039_s13, 3  ;;  %s230_s11 = scalar_lea.sflag [#allocation3], %s1039_s13 }
  0x62   : > { %s233_s29 = scalar_lea.vmem [#allocation6], %s533_s30 }
  0x63   : > { %791 = dma.done.wait (%p1142_p0), %s230_s11, 128  }
  0x64   : > { %793 = vsyncadd (%p1142_p0), %s230_s11, 4294967168 }
  0x65   : > { %795 = dma.done.wait (%p1141_p5), [#allocation8], 512  }
  0x66   : > { %797 = vsyncadd (%p1141_p5), [#allocation8], 4294966784 }
  0x67   : > { %242 = sfence }
  0x68   : > { %v272_v0 = vld [vmem:[#allocation7] sm:$0xff]  ;;  %v273_v1 = vld [vmem:[#allocation7 + $0x8] sm:$0xff]  ;;  %v274_v2 = vld [vmem:[#allocation7 + $0x10] sm:$0xff]  ;;  %v831_v3 = vmov 0.0|0.0   ;;  %vm268_vm0 = vcmask 261120   ;;  %s1051_s27 = scalar_lea.vmem [#allocation9], %s533_s30  ;;  %v367_v13 = vlaneseq }
  0x69   : > { %561 = vmatprep.subr.bf16.mxu0 %v831_v3  ;;  %v562_v4 = vpack.c.bf16 %v273_v1, %v272_v0  ;;  %v275_v5 = vld [vmem:[#allocation7 + $0x18] sm:$0xff]  ;;  %v832_v6 = vmov 0.0   ;;  %vm833_vm1 = vmmov 0   ;;  %v537_v15 = vld [vmem:[%s1127_s3] ss:$0 sm:$0xff]  ;;  %s364_s9 = sld [smem:[#allocation2]] }
  0x6a   : > { %269 = vst.msk [vmem:[%s1051_s27] sm:$0xff] %vm268_vm0, %v832_v6  ;;  %558 = vmatprep.mubr.msk.f32.mxu0 %vm833_vm1, %v832_v6  ;;  %v565_v7 = vpack.c.bf16 %v275_v5, %v274_v2  ;;  %v271_v8 = vld [vmem:[%s233_s29] sm:$0xff]  ;;  %v368_v14 = vand.u32 127, %v367_v13  ;;  %s538_s10 = sld [smem:[#allocation2 + $0x1]]  ;;  %s539_s12 = sld [smem:[#allocation2 + $0x2]] }
  0x6b   : > { %563 = vmatpush3.bf16.msra.mxu0 %v562_v4  ;;  %s542_s5 = sshll.u32 %s816_s18, 7  ;;  %s420_s7 = sshll.u32 %s1051_s27, 4  ;;  %s1074_s7 = int_to_ptr.vmem [resolvable:$true] %s420_s7 }
  0x6c   : > { %564 = vmatprep.subr.bf16.mxu0 %v831_v3  ;;  %vm369_vm2 = vcmp.eq.s32.totalorder %v368_v14, 0  ;;  %s1072_s24 = scalar_lea.hbm %s1128_s4, %s542_s5  ;;  %s407_s21 = scalar_lea.sflag [#allocation4], %s1039_s13 }
  0x6d   : > { %s734_s30 = scalar_lea.vmem %s1074_s7, 128  ;;  %p1143_p2 = scmp.ne.s32.totalorder %s1139_s22, 0 }
  0x6e   : > { %p735_p8 = scmp.ne.s32.totalorder %s1074_s7, %s734_s30  ;;  %s834_s18 = smov [#allocation9]  }
  0x6f   : > { %566 = vmatpush3.bf16.msra.mxu0 %v565_v7  ;;  %v380_v29 = vstv %s364_s9  ;;  %s738_s11 = sshll.u32 %s834_s18, 4  ;;  %s739_s11 = int_to_ptr.vmem [resolvable:$false] %s738_s11 }
  0x70   : > { %v382_v31 = vstv %s538_s10  ;;  %v391_v34 = vstv %s539_s12  ;;  %p736_p10 = pnand %p735_p8, %p1143_p2  ;;  %s740_s29 = scalar_lea.vmem %s739_s11, 256 }
  0x71   : > { %v270_v9 = vld [vmem:[%s1051_s27] sm:$0xff]  ;;  %p741_p9 = scmp.lt.s32.totalorder %s1074_s7, %s739_s11  ;;  %p742_p13 = scmp.lt.s32.totalorder %s740_s29, %s734_s30 }
  0x72   : > { %559 = vmatmul.mubr.msk.f32.vlgmr.msra.gmra.mrb[0].mxu0 %vm268_vm0, %v271_v8  ;;  %p737_p6 = pneg %p736_p10 }
  0x73   : > { %p743_p3 = por %p742_p13, %p741_p9 }
  0x75   : > { %p744_p11 = pnand %p743_p3, %p737_p6 }
 0x145   : > { %v346_v10 = vpop.f32.mrb[0].mxu0 }
 0x146   : > { %v350_v11 = vadd.f32 %v346_v10, %v270_v9  ;;  %v560_v12 = vpop.f32.mrb[1].mxu0 }
 0x148   : > { %351 = vst.msk [vmem:[%s1051_s27] sm:$0xff] %vm268_vm0, %v350_v11 }
 0x14f   : > { %v355_v16 = vld [vmem:[%s1051_s27] sm:$0xff] }
 0x150   : > { %v363_v17 = vadd.f32 %v537_v15, %v355_v16 }
 0x152   : > { %v370_v18 = vsel %vm369_vm2, %v363_v17, 0.0  ;;  %v384_v19 = vsel %vm369_vm2, 0.0, %v363_v17 }
 0x153   : > { %v371_v20 = vsel %vm268_vm0, %v370_v18, 0.0  ;;  %v385_v21 = vmul.f32 %v384_v19, %v384_v19 }
 0x154   : > { %372 = vadd.xlane.f32.xlu0 %v371_v20 }
 0x155   : > { %v386_v22 = vsel %vm268_vm0, %v385_v21, 0.0 }
 0x158   : > { %387 = vadd.xlane.f32.xlu0 %v386_v22 }
 0x1e1   : > { %v373_v23 = vpop.xlane.xlu0 %372 }
 0x1e2   : > { %v540_v24 = vmul.f32 -1.442695, %v373_v23 }
 0x1e4   : > { %655 = vpow2.f32 %v540_v24 }
 0x1e5   : > { %v388_v27 = vpop.xlane.xlu0 %387 }
 0x1e6   : > { %v389_v28 = vmax.f32 %v388_v27, 1e-06 }
 0x1ee   : > { %v656_v25 = vpop.eup %655 }
 0x1ef   : > { %v377_v26 = vadd.f32 1.0, %v656_v25 }
 0x1f1   : > { %657 = vrcp.f32 %v377_v26 }
 0x1f2   : > { %659 = vrcp.f32 %v389_v28 }
 0x1fb   : > { %v658_v30 = vpop.eup %657 }
 0x1fc   : > { %v381_v32 = vmul.f32 %v658_v30, %v380_v29  ;;  %v660_v37 = vpop.eup %659 }
 0x1fe   : > { %v383_v33 = vadd.f32 %v382_v31, %v381_v32 }
 0x200   : > { %v390_v35 = vmul.f32 %v383_v33, %v383_v33 }
 0x202   : > { %v392_v36 = vsub.f32 %v390_v35, %v391_v34 }
 0x204   : > { %v394_v38 = vmul.f32 %v660_v37, %v392_v36 }
 0x206   : > { %v395_v39 = vmax.f32 %v394_v38, 1e-06 }
 0x208   : > { %661 = vrsqrt.f32 %v395_v39  ;;  %vm398_vm3 = vcmp.eq.f32.partialorder %v395_v39, inf  ;;  %v401_v42 = vand.u32 2147483648, %v395_v39  ;;  %vm400_vm4 = vcmp.eq.f32.partialorder %v395_v39, 0.0 }
 0x212   : > { %v662_v40 = vpop.eup %661 }
 0x213   : > { %v397_v41 = vmul.f32 %v662_v40, %v395_v39 }
 0x215   : > { %v399_v43 = vsel %vm398_vm3, %v395_v39, %v397_v41 }
 0x216   : > { %v402_v44 = vsel %vm400_vm4, %v401_v42, %v399_v43 }
 0x217   : > { %v403_v45 = vmul.f32 %v402_v44, %v384_v19 }
 0x219   : > { %v404_v46 = vsel %vm369_vm2, %v383_v33, %v403_v45 }
 0x21a   : > { %405 = vst.msk [vmem:[%s1051_s27] sm:$0xff] %vm268_vm0, %v404_v46 }
 0x21b   : > { %747 = shalt.err (!%p744_p11)
}
 0x21c   : > { %s748_s13 = scalar_lea.hbm %s1072_s24, 128  ;;  %s752_s25 = scalar_lea.hbm %s1128_s4, 256 }
 0x21d   : > { %p749_p7 = scmp.ne.s32.totalorder %s1072_s24, %s748_s13  ;;  %p753_p4 = scmp.lt.u32.totalorder %s1072_s24, %s1128_s4 }
 0x21e   : > { %p754_p5 = scmp.lt.u32.totalorder %s752_s25, %s748_s13  ;;  %p756_p8 = scmp.lt.u32.totalorder %s748_s13, %s1072_s24 }
 0x21f   : > { %p750_p12 = pnand %p749_p7, %p1143_p2 }
 0x220   : > { %p755_p0 = por %p754_p5, %p753_p4 }
 0x221   : > { %p751_p1 = pneg %p750_p12 }
 0x222   : > { %p757_p10 = por %p756_p8, %p755_p0 }
 0x224   : > { %p758_p6 = pnand %p757_p10, %p751_p1 }
 0x226   : > { %761 = shalt.err (!%p758_p6)
}
 0x227   : > { %577 = dma.vmem_to_hbm [thread:$0]  (%p1143_p2), %s1074_s7, 128, %s1072_s24, %s407_s21  }
 0x228 PF: > { %s432_s12 = sand.u32 1, %s804_s15   ;;  %p1144_p9 = scmp.ne.s32.totalorder %s1136_s26, 0 }
 0x229   : > { %p1145_p13 = scmp.ge.s32.totalorder %s824_s20, 2  ;;  %s433_s5 = scalar_lea.sflag [#allocation4], %s432_s12 }
 0x22b   : > { %p591_p3 = pnand %p1145_p13, %p1144_p9 }
 0x22d   : > { %799 = dma.done.wait (!%p591_p3), %s433_s5, 128  }
 0x22e   : > { %801 = vsyncadd (!%p591_p3), %s433_s5, 4294967168  ;;  %s22_s20 = sadd.s32 1, %s824_s20   ;;  %s1146_s15 = smov %s808_s16 }
 0x22f   : > { %p19_p11 = scmp.ge.s32.totalorder %s22_s20, 4   ;;  %s1147_s16 = smov %s812_s17 }
 0x230   : > { %s1148_s17 = smov %s992_s6  ;;  %s1149_s18 = smov %s820_s19 }
 0x231   : > { %s1150_s19 = smov %s1152_s14  ;;  %21 = sbr.rel (!%p19_p11) target bundleno = 8 (0x8), region = 99 }
 0x238   :  { %438 = vsyncpa [#allocation3], 1 }
 0x239   :  { %440 = vsyncpa [#allocation3 + $0x1], 1 }
 0x23a   :  { %441 = vsyncpa [#allocation8], 1 }
 0x23b   :  { %442 = vsyncpa [#allocation4], 1 }
 0x23c   :  { %444 = vsyncpa [#allocation4 + $0x1], 1 }
 0x23d   :  { %445 = vsyncpa [#allocation5], 1 }
 0x23e   :  { %447 = vsyncpa [#allocation5 + $0x1], 1 }

</bundles_post_ra>
